<compile_context>
chip_gen: v5e
topology: v5e:2x2
jax: 0.10.0
libtpu: 0.0.40
codegen_flags: <defaults>
</compile_context>

<pallas_src>
import functools

import jax
import jax.numpy as jnp
from jax.experimental import pallas as pl
from jax.experimental.pallas import tpu as pltpu


def _round_up(n: int, m: int) -> int:
    return ((n + m - 1) // m) * m


def _mlp_kernel(x_ref, w1_ref, w2_ref, b2_ref, o_ref):
    # x_ref : (8, TB)   columns = batch samples, row 7 == 1.0 (bias input)
    # w1_ref: (50, 8)   [W1^T | b1]  -- first-layer bias folded into the matmul
    # w2_ref: (3, 50)   W2^T
    # b2_ref: (3, 1)
    # o_ref : (3, TB)
    h = jnp.tanh(
        jnp.dot(w1_ref[...], x_ref[...], preferred_element_type=jnp.float32)
    )                                                           # (50, TB)
    y = jnp.dot(w2_ref[...], h, preferred_element_type=jnp.float32)
    o_ref[...] = (y + b2_ref[...]).astype(o_ref.dtype)          # (3, TB)


@functools.partial(jax.jit, static_argnames=("tb",))
def sat_simple_net(x, w1, b1, w2, b2, *, tb=8192):
    """x: (B, 7) f32; w1: (7, 50); b1: (50,); w2: (50, 3); b2: (3,) -> (B, 3)."""
    B = x.shape[0]
    tb = max(128, _round_up(tb, 128))
    TB = min(tb, _round_up(B, 128))          # lane-dense batch tile (mult. of 128)
    B_pad = _round_up(B, TB)
    grid = (B_pad // TB,)

    # One fused pad: transpose, append the constant-1 bias row (row 7) and pad
    # the batch (lane) axis up to B_pad.  Pad columns are 1.0 -> finite garbage
    # that is sliced away below; they never poison valid lanes.
    x_t = jnp.pad(x.T, ((0, 1), (0, B_pad - B)), constant_values=1.0)   # (8, B_pad)

    # [W1^T | b1] : (50, 8); W2^T : (3, 50); b2 : (3, 1).
    w1_aug = jnp.concatenate([w1.T, b1[:, None]], axis=1)
    w2_t = w2.T
    b2_col = b2[:, None]

    flops = 2 * B_pad * (8 * 50 + 50 * 3)
    bytes_accessed = 4 * (11 * B_pad + 50 * 8 + 3 * 50 + 3)

    out_t = pl.pallas_call(
        _mlp_kernel,
        out_shape=jax.ShapeDtypeStruct((3, B_pad), jnp.float32),
        grid=grid,
        in_specs=[
            pl.BlockSpec((8, TB), lambda i: (0, i)),    # x tile (streamed / pipelined)
            pl.BlockSpec((50, 8), lambda i: (0, 0)),    # W1 (pinned in VMEM)
            pl.BlockSpec((3, 50), lambda i: (0, 0)),    # W2 (pinned)
            pl.BlockSpec((3, 1), lambda i: (0, 0)),     # b2 (pinned)
        ],
        out_specs=pl.BlockSpec((3, TB), lambda i: (0, i)),
        compiler_params=pltpu.CompilerParams(
            dimension_semantics=("parallel",),
        ),
        cost_estimate=pl.CostEstimate(
            flops=flops,
            transcendentals=50 * B_pad,
            bytes_accessed=bytes_accessed,
        ),
    )(x_t, w1_aug, w2_t, b2_col)

    return out_t[:, :B].T                                # (B, 3)


def init_params(key):
    """Deterministic init mirroring nn.Linear's default U(-1/sqrt(fan_in), +1/sqrt(fan_in))."""
    k1, k2, k3, k4 = jax.random.split(key, 4)
    bound1 = 1.0 / jnp.sqrt(7.0)
    bound2 = 1.0 / jnp.sqrt(50.0)
    # Stored as (in, out) — equivalent to PyTorch's (out, in) weight transposed.
    w1 = jax.random.uniform(k1, (7, 50), jnp.float32, -bound1, bound1)
    b1 = jax.random.uniform(k2, (50,), jnp.float32, -bound1, bound1)
    w2 = jax.random.uniform(k3, (50, 3), jnp.float32, -bound2, bound2)
    b2 = jax.random.uniform(k4, (3,), jnp.float32, -bound2, bound2)
    return w1, b1, w2, b2


def reference(x, w1, b1, w2, b2):
    h = jnp.tanh(x @ w1 + b1)
    return h @ w2 + b2


if __name__ == "__main__":
    key = jax.random.PRNGKey(0)
    kx, kx2, kp = jax.random.split(key, 3)

    w1, b1, w2, b2 = init_params(kp)

    # Small canonical case.
    B = 8
    x = jax.random.normal(kx, (B, 7), jnp.float32)
    out = jax.block_until_ready(sat_simple_net(x, w1, b1, w2, b2))
    ref = reference(x, w1, b1, w2, b2)
    assert out.shape == (B, 3), out.shape
    assert jnp.allclose(out, ref, atol=1e-5, rtol=1e-5), "mismatch vs. pure-JAX reference (B=8)"

    # Non-multiple-of-128 batch to exercise the lane-padding / slice path.
    B2 = 300
    x2 = jax.random.normal(kx2, (B2, 7), jnp.float32)
    out2 = jax.block_until_ready(sat_simple_net(x2, w1, b1, w2, b2))
    ref2 = reference(x2, w1, b1, w2, b2)
    assert out2.shape == (B2, 3), out2.shape
    assert jnp.allclose(out2, ref2, atol=1e-5, rtol=1e-5), "mismatch vs. pure-JAX reference (B=300)"

    print("KERNEL_OK")
</pallas_src>

<mosaic_0001>
module attributes {stable_mosaic.version = 11 : i64} {
  func.func @_mlp_kernel(%arg0: i32, %arg1: memref<8x128xf32, #tpu.memory_space<vmem>>, %arg2: memref<50x8xf32, #tpu.memory_space<vmem>>, %arg3: memref<3x50xf32, #tpu.memory_space<vmem>>, %arg4: memref<3x1xf32, #tpu.memory_space<vmem>>, %arg5: memref<3x128xf32, #tpu.memory_space<vmem>>) attributes {dimension_semantics = [#tpu.dimension_semantics<parallel>], iteration_bounds = array<i64: 1>, scalar_prefetch = 0 : i64, scratch_operands = 0 : i64, tpu.core_type = #tpu.core_type<tc>, window_params = [{transform_indices = @transform_0, window_bounds = array<i64: 8, 128>}, {pipeline_mode = #tpu.pipeline_mode<synchronous>, transform_indices = @transform_1, window_bounds = array<i64: 50, 8>}, {pipeline_mode = #tpu.pipeline_mode<synchronous>, transform_indices = @transform_2, window_bounds = array<i64: 3, 50>}, {pipeline_mode = #tpu.pipeline_mode<synchronous>, transform_indices = @transform_3, window_bounds = array<i64: 3, 1>}, {transform_indices = @transform_4, window_bounds = array<i64: 3, 128>}]} {
    %c0 = arith.constant 0 : index
    %c0_0 = arith.constant 0 : index
    %0 = vector.load %arg2[%c0, %c0_0] : memref<50x8xf32, #tpu.memory_space<vmem>>, vector<50x8xf32>
    %c0_1 = arith.constant 0 : index
    %c0_2 = arith.constant 0 : index
    %1 = vector.load %arg1[%c0_1, %c0_2] : memref<8x128xf32, #tpu.memory_space<vmem>>, vector<8x128xf32>
    %cst = arith.constant dense<0.000000e+00> : vector<50x128xf32>
    %2 = tpu.matmul %0, %1, %cst {dimension_numbers = #tpu.dot_dimension_numbers<[1], [0], [0], [1], [0, 0, 1, 1], [], []>} : vector<50x8xf32>, vector<8x128xf32>, vector<50x128xf32> -> vector<50x128xf32>
    %3 = math.tanh %2 : vector<50x128xf32>
    %c0_3 = arith.constant 0 : index
    %c0_4 = arith.constant 0 : index
    %4 = vector.load %arg3[%c0_3, %c0_4] : memref<3x50xf32, #tpu.memory_space<vmem>>, vector<3x50xf32>
    %cst_5 = arith.constant dense<0.000000e+00> : vector<3x128xf32>
    %5 = tpu.matmul %4, %3, %cst_5 {dimension_numbers = #tpu.dot_dimension_numbers<[1], [0], [0], [1], [0, 0, 1, 1], [], []>} : vector<3x50xf32>, vector<50x128xf32>, vector<3x128xf32> -> vector<3x128xf32>
    %c0_6 = arith.constant 0 : index
    %c0_7 = arith.constant 0 : index
    %6 = vector.load %arg4[%c0_6, %c0_7] : memref<3x1xf32, #tpu.memory_space<vmem>>, vector<3x1xf32>
    %7 = vector.broadcast %6 : vector<3x1xf32> to vector<3x128xf32>
    %8 = arith.addf %5, %7 : vector<3x128xf32>
    %c0_8 = arith.constant 0 : index
    %c0_9 = arith.constant 0 : index
    %9 = vector.load %arg5[%c0_8, %c0_9] : memref<3x128xf32, #tpu.memory_space<vmem>>, vector<3x128xf32>
    tpu.vector_store %arg5[%c0_8, %c0_9], %8 {strides = array<i32>} : memref<3x128xf32, #tpu.memory_space<vmem>>, vector<3x128xf32>,
    return
  }
  func.func @transform_0(%arg0: i32) -> (i32, i32) {
    %c0_i32 = arith.constant 0 : i32
    %c0_i32_0 = arith.constant 0 : i32
    return %c0_i32, %arg0 : i32, i32
  }
  func.func @transform_1(%arg0: i32) -> (i32, i32) {
    %c0_i32 = arith.constant 0 : i32
    %c0_i32_0 = arith.constant 0 : i32
    %c0_i32_1 = arith.constant 0 : i32
    return %c0_i32, %c0_i32_0 : i32, i32
  }
  func.func @transform_2(%arg0: i32) -> (i32, i32) {
    %c0_i32 = arith.constant 0 : i32
    %c0_i32_0 = arith.constant 0 : i32
    %c0_i32_1 = arith.constant 0 : i32
    return %c0_i32, %c0_i32_0 : i32, i32
  }
  func.func @transform_3(%arg0: i32) -> (i32, i32) {
    %c0_i32 = arith.constant 0 : i32
    %c0_i32_0 = arith.constant 0 : i32
    %c0_i32_1 = arith.constant 0 : i32
    return %c0_i32, %c0_i32_0 : i32, i32
  }
  func.func @transform_4(%arg0: i32) -> (i32, i32) {
    %c0_i32 = arith.constant 0 : i32
    %c0_i32_0 = arith.constant 0 : i32
    return %c0_i32, %arg0 : i32, i32
  }
}

</mosaic_0001>

<bundles_post_ra>
// kernel: sat_simple_net.1
= control target key start
LH: loop header
LB: loop body
LE: loop exit
PB: predicated region body
PF: predicated region fallthrough
CT: control target
= control target key end

     0   :  { %vm25_vm0 = vcmask 64512   ;;  %v159_v11 = vmov 0   ;;  %vm103_vm1 = vcmask 1041408   ;;  %vm99_vm2 = vcmask 408576   ;;  %s225_s0 = inlined_call_operand.vmem [shape: f32[8,128], index: 0, kind: input, shape index: {}]   ;;  %s226_s1 = inlined_call_operand.vmem [shape: f32[50,8], index: 1, kind: input, shape index: {}]   ;;  %s227_s3 = inlined_call_operand.vmem [shape: f32[3,1], index: 3, kind: input, shape index: {}]   ;;  %s228_s2 = inlined_call_operand.vmem [shape: f32[3,50], index: 2, kind: input, shape index: {}]   ;;  %s229_s4 = inlined_call_operand.vmem [shape: f32[3,128], index: 4, kind: output, shape index: {}]  }
   0x1   :  { %v24_v0 = vld [vmem:[%s225_s0] sm:$0xff]  ;;  %v20_v3 = vld [vmem:[%s226_s1 + $0x18] sm:$0xff]  ;;  %v22_v4 = vld [vmem:[%s226_s1 + $0x28] sm:$0xff]  ;;  %144 = vset.pattern.permute.xlu0 %v159_v11 }
   0x2   :  { %v21_v1 = vld [vmem:[%s226_s1 + $0x20] sm:$0xff]  ;;  %142 = vmatpush.msra.mxu3 %v24_v0  ;;  %62 = vmatpush.msra.mxu0 %v24_v0  ;;  %v18_v5 = vld [vmem:[%s226_s1 + $0x8] sm:$0xff]  ;;  %v23_v6 = vld [vmem:[%s226_s1 + $0x30] sm:$0x3] }
   0x3   :  { %v17_v2 = vld [vmem:[%s226_s1] sm:$0xff]  ;;  %136 = vmatmul.msk.f32.vlgmr.msra.gmra.mxu3 %vm25_vm0, %v21_v1  ;;  %141 = vmatpush.msra.mxu2 %v24_v0  ;;  %v19_v7 = vld [vmem:[%s226_s1 + $0x10] sm:$0xff] }
   0x4   :  { %132 = vmatmul.msk.f32.vlgmr.msra.gmra.mxu0 %vm25_vm0, %v17_v2  ;;  %135 = vmatmul.msk.f32.vlgmr.msra.gmra.mxu2 %vm25_vm0, %v20_v3  ;;  %v93_v10 = vld [vmem:[%s227_s3] sm:$0x7] }
   0x5   :  { %96 = vperm.xlu0 %144, %v93_v10   ;;  %v92_v23 = vld [vmem:[%s228_s2] sm:$0x7] }
   0xb   :  { %137 = vmatmul.msk.f32.gmra.mxu3 %vm25_vm0, %v22_v4 }
   0xc   :  { %133 = vmatmul.msk.f32.gmra.mxu0 %vm25_vm0, %v18_v5 }
  0x13   :  { %138 = vmatmul.msk.f32.gmra.mxu3 %vm25_vm0, %v23_v6 }
  0x14   :  { %134 = vmatmul.msk.f32.gmra.mxu0 %vm25_vm0, %v19_v7 }
  0x77   :  { %v97_v25 = vpop.permute.xlu0 %96 }
  0x81   :  { %v64_v9 = vpop.f32.mrf.mxu0 }
  0x86   :  { %v76_v8 = vpop.f32.mrf.mxu3 }
  0x87   :  { %v73_v15 = vpop.f32.mrf.mxu2 }
  0x89   :  { %v67_v13 = vpop.f32.mrf.mxu0 }
  0x8e   :  { %v79_v12 = vpop.f32.mrf.mxu3 }
  0x91   :  { %v70_v16 = vpop.f32.mrf.mxu0 }
  0x96   :  { %v82_v14 = vpop.f32.mrf.mxu3 }
  0x97   :  { %145 = vtanh.f32 %v82_v14 }
  0x98   :  { %147 = vtanh.f32 %v79_v12 }
  0x99   :  { %149 = vtanh.f32 %v76_v8 }
  0x9a   :  { %151 = vtanh.f32 %v73_v15 }
  0x9b   :  { %153 = vtanh.f32 %v70_v16 }
  0x9c   :  { %155 = vtanh.f32 %v67_v13 }
  0x9d   :  { %v146_v17 = vpop.eup %145  ;;  %157 = vtanh.f32 %v64_v9 }
  0x9e   :  { %139 = vmatpush.msk.msra.mxu1 %vm103_vm1, %v146_v17  ;;  %v148_v18 = vpop.eup %147 }
  0x9f   :  { %v150_v19 = vpop.eup %149 }
  0xa0   :  { %117 = vmatpush.msra.mxu1 %v148_v18  ;;  %v152_v20 = vpop.eup %151 }
  0xa1   :  { %v154_v21 = vpop.eup %153 }
  0xa2   :  { %118 = vmatpush.msra.mxu1 %v150_v19  ;;  %v156_v22 = vpop.eup %155 }
  0xa3   :  { %v158_v24 = vpop.eup %157 }
  0xa4   :  { %119 = vmatpush.msra.mxu1 %v152_v20 }
  0xa6   :  { %120 = vmatpush.msra.mxu1 %v154_v21 }
  0xa8   :  { %121 = vmatpush.msra.mxu1 %v156_v22 }
  0xaa   :  { %122 = vmatpush.msra.mxu1 %v158_v24 }
  0xab   :  { %140 = vmatmul.msk.f32.vlgmr.msra.gmra.mxu1 %vm99_vm2, %v92_v23 }
 0x128   :  { %v124_v26 = vpop.f32.mrf.mxu1 }
 0x129   :  { %v125_v27 = vadd.f32 %v124_v26, %v97_v25 }
 0x12b   :  { %127 = vst [vmem:[%s229_s4] sm:$0x7] %v125_v27 }

</bundles_post_ra>
